<compile_context>
chip_gen: v6e
topology: v6e:2x2x1
jax: 0.10.0
libtpu: 0.0.40
codegen_flags: <defaults>
</compile_context>

<pallas_src>
import functools
import math

import jax
import jax.numpy as jnp
from jax.experimental import pallas as pl
from jax.experimental.pallas import tpu as pltpu

LOG_STD_MAX = 2.0
LOG_STD_MIN = -20.0

_HALF_LOG_2PI = 0.5 * math.log(2.0 * math.pi)
_LOG_2 = math.log(2.0)


def _round_up(x, m):
    return ((x + m - 1) // m) * m


def _actor_kernel(*refs, act_limit, deterministic, act_dim, act_pad):
    if deterministic:
        (obs_ref, w1_ref, b1_ref, w2_ref, b2_ref, wh_ref, bh_ref,
         pi_ref, logp_ref) = refs
        eps = None
    else:
        (obs_ref, eps_ref, w1_ref, b1_ref, w2_ref, b2_ref, wh_ref, bh_ref,
         pi_ref, logp_ref) = refs
        eps = eps_ref[...].astype(jnp.float32)             # [TM, act_dim]

    # ---- MLP trunk (activation = ReLU, output_activation = ReLU) ----
    # bf16 operands on the MXU, f32 accumulation, f32 bias/ReLU.
    x = obs_ref[...].astype(jnp.bfloat16)
    h = jnp.dot(x, w1_ref[...], preferred_element_type=jnp.float32) + b1_ref[...]
    h = jnp.maximum(h, 0.0).astype(jnp.bfloat16)
    h = jnp.dot(h, w2_ref[...], preferred_element_type=jnp.float32) + b2_ref[...]
    h = jnp.maximum(h, 0.0).astype(jnp.bfloat16)           # [TM, hidden]

    # ---- fused mu / log_std head: one MXU pass, 2*AP lanes wide ----
    head = jnp.dot(h, wh_ref[...], preferred_element_type=jnp.float32) + bh_ref[...]
    mu = head[:, :act_dim]                                 # offset-0 slice
    log_std = head[:, act_pad:act_pad + act_dim]           # 128-aligned slice
    log_std = jnp.clip(log_std, LOG_STD_MIN, LOG_STD_MAX)
    std = jnp.exp(log_std)

    # ---- reparameterized sample: pi = mu + std * eps (z == eps exactly) ----
    if deterministic:
        pi_action = mu
        sq_term = jnp.zeros_like(mu)                       # z == 0
    else:
        pi_action = mu + std * eps
        sq_term = 0.5 * eps * eps

    # ---- Normal log-prob + tanh-squash correction (all at act_dim width) ----
    # Share a = exp(-2|pi|) between the stable softplus and tanh; EUP is the
    # narrow slot when hidden is small.
    a = jnp.exp(-2.0 * jnp.abs(pi_action))
    softplus_m2pi = jnp.maximum(-2.0 * pi_action, 0.0) + jnp.log1p(a)
    log_prob = -sq_term - log_std - _HALF_LOG_2PI
    corr = 2.0 * (_LOG_2 - pi_action - softplus_m2pi)
    logp_ref[...] = jnp.sum(log_prob - corr, axis=-1,
                            keepdims=True).astype(logp_ref.dtype)

    # tanh(pi) = sign(pi) * (1 - a) / (1 + a); reciprocal on the EUP approx path.
    t_abs = (1.0 - a) * pl.reciprocal(1.0 + a, approx=True)
    tanh_pi = jnp.where(pi_action >= 0.0, t_abs, -t_abs)
    pi_ref[...] = (act_limit * tanh_pi).astype(pi_ref.dtype)


def prepare_params(params):
    """One-time parameter preparation (NOT per forward call).

    Fuses mu/log_std heads into one lane-padded weight, zero-pads the padding
    columns, and casts matmul weights to bf16 (biases stay f32).
    """
    w1, b1, w2, b2, wmu, bmu, wls, bls = params
    hidden = w2.shape[1]
    act_dim = wmu.shape[1]
    act_pad = _round_up(max(act_dim, 1), 128)

    wh = jnp.zeros((hidden, 2 * act_pad), jnp.float32)
    wh = wh.at[:, :act_dim].set(wmu).at[:, act_pad:act_pad + act_dim].set(wls)
    bh = jnp.zeros((1, 2 * act_pad), jnp.float32)
    bh = bh.at[:, :act_dim].set(bmu).at[:, act_pad:act_pad + act_dim].set(bls)

    return dict(
        w1=w1.astype(jnp.bfloat16), b1=b1.astype(jnp.float32),
        w2=w2.astype(jnp.bfloat16), b2=b2.astype(jnp.float32),
        wh=wh.astype(jnp.bfloat16), bh=bh.astype(jnp.float32),
        obs_dim=w1.shape[0], hidden=hidden, act_dim=act_dim, act_pad=act_pad)


def squashed_gaussian_actor(obs, eps, prepared, *, act_limit=1.0,
                            deterministic=False):
    """Actor forward pass in a single Pallas kernel.

    Returns (pi_action [B, act_dim], logp_pi [B]).
    """
    act_dim = prepared["act_dim"]
    act_pad = prepared["act_pad"]
    hidden = prepared["hidden"]
    B, obs_dim = obs.shape

    # ---- batch tiling ----
    if B <= 256:
        tm = _round_up(max(B, 1), 8)
    else:
        # >= 2 grid steps so v7x megacore can shard the batch; 512-1024 rows
        # per step amortizes ~0.35us/step overhead.
        tm = min(1024, _round_up((B + 1) // 2, 8))
        # Bound live f32 activations (tm x hidden) to a few MiB.
        max_rows = max(256, (((4 << 20) // (4 * max(hidden, 1))) // 8) * 8)
        tm = min(tm, max_rows)
    bp = _round_up(B, tm)

    # ---- batch-streamed inputs (row-padded only when needed) ----
    arrays = [obs.astype(jnp.float32)]
    specs = [pl.BlockSpec((tm, obs_dim), lambda i: (i, 0))]
    if not deterministic:
        arrays.append(eps.astype(jnp.float32))             # natural [B, act_dim]
        specs.append(pl.BlockSpec((tm, act_dim), lambda i: (i, 0)))
    if bp != B:
        arrays = [jnp.pad(a, ((0, bp - B), (0, 0))) for a in arrays]

    weights = (prepared["w1"], prepared["b1"], prepared["w2"], prepared["b2"],
               prepared["wh"], prepared["bh"])

    # ---- explicit VMEM budget ----
    weight_bytes = sum(int(w.size) * w.dtype.itemsize for w in weights)
    io_bytes = tm * 4 * (obs_dim + (0 if deterministic else act_dim) + act_dim + 1)
    act_bytes = 6 * tm * max(hidden, 2 * act_pad) * 4
    budget = 2 * weight_bytes + 3 * io_bytes + act_bytes + (4 << 20)
    vmem_limit = int(min(max(budget, 16 << 20), 128 << 20))

    kernel = functools.partial(
        _actor_kernel, act_limit=float(act_limit),
        deterministic=bool(deterministic), act_dim=act_dim, act_pad=act_pad)

    def build(single_buffer_weights):
        w_specs = []
        for w in weights:
            kw = {"pipeline_mode": pl.Buffered(1)} if single_buffer_weights else {}
            # Constant index_map -> weights stay VMEM-resident across the grid.
            w_specs.append(pl.BlockSpec(w.shape, lambda i: (0, 0), **kw))
        return pl.pallas_call(
            kernel,
            out_shape=(jax.ShapeDtypeStruct((bp, act_dim), jnp.float32),
                       jax.ShapeDtypeStruct((bp, 1), jnp.float32)),
            grid=(bp // tm,),
            in_specs=specs + w_specs,
            out_specs=(pl.BlockSpec((tm, act_dim), lambda i: (i, 0)),
                       pl.BlockSpec((tm, 1), lambda i: (i, 0))),
            compiler_params=pltpu.CompilerParams(
                dimension_semantics=("parallel",),
                vmem_limit_bytes=vmem_limit),
        )

    args = arrays + list(weights)
    try:
        pi, logp = build(True)(*args)
        jax.block_until_ready((pi, logp))
    except Exception:
        # Fallback for JAX versions where single-buffering resident inputs via
        # pl.Buffered(1) is not supported by the pallas_call pipeline.
        pi, logp = build(False)(*args)

    return pi[:B], logp[:B, 0]


def init_params(key, obs_dim, hidden_sizes, act_dim):
    """Deterministic parameter init (weights stored as [in, out], f32)."""
    sizes = [obs_dim] + list(hidden_sizes)
    params = []
    keys = jax.random.split(key, 2 * (len(sizes) - 1) + 4)
    ki = 0
    for i in range(len(sizes) - 1):
        fan_in = sizes[i]
        bound = 1.0 / math.sqrt(fan_in)
        w = jax.random.uniform(keys[ki], (sizes[i], sizes[i + 1]),
                               minval=-bound, maxval=bound, dtype=jnp.float32)
        ki += 1
        b = jax.random.uniform(keys[ki], (1, sizes[i + 1]),
                               minval=-bound, maxval=bound, dtype=jnp.float32)
        ki += 1
        params += [w, b]
    fan_in = hidden_sizes[-1]
    bound = 1.0 / math.sqrt(fan_in)
    wmu = jax.random.uniform(keys[ki], (fan_in, act_dim),
                             minval=-bound, maxval=bound, dtype=jnp.float32); ki += 1
    bmu = jax.random.uniform(keys[ki], (1, act_dim),
                             minval=-bound, maxval=bound, dtype=jnp.float32); ki += 1
    wls = jax.random.uniform(keys[ki], (fan_in, act_dim),
                             minval=-bound, maxval=bound, dtype=jnp.float32); ki += 1
    bls = jax.random.uniform(keys[ki], (1, act_dim),
                             minval=-bound, maxval=bound, dtype=jnp.float32); ki += 1
    return tuple(params) + (wmu, bmu, wls, bls)


def _reference(obs, eps, params, act_limit, deterministic):
    """Pure-JAX f32 reference matching the PyTorch forward pass."""
    w1, b1, w2, b2, wmu, bmu, wls, bls = params
    dot = functools.partial(jnp.dot, precision=jax.lax.Precision.HIGHEST)
    h = jnp.maximum(dot(obs, w1) + b1, 0.0)
    h = jnp.maximum(dot(h, w2) + b2, 0.0)
    mu = dot(h, wmu) + bmu
    log_std = jnp.clip(dot(h, wls) + bls, LOG_STD_MIN, LOG_STD_MAX)
    std = jnp.exp(log_std)
    pi = mu if deterministic else mu + std * eps
    logp = jnp.sum(-0.5 * ((pi - mu) / std) ** 2 - log_std - _HALF_LOG_2PI, axis=-1)
    logp = logp - jnp.sum(2.0 * (_LOG_2 - pi - jax.nn.softplus(-2.0 * pi)), axis=-1)
    return act_limit * jnp.tanh(pi), logp


if __name__ == "__main__":
    key = jax.random.PRNGKey(0)
    k_obs, k_eps, k_params = jax.random.split(key, 3)

    batch = 8
    obs_dim = 16
    hidden_sizes = (32, 32)
    act_dim = 8
    act_limit = 1.0

    obs = jax.random.normal(k_obs, (batch, obs_dim), dtype=jnp.float32)
    eps = jax.random.normal(k_eps, (batch, act_dim), dtype=jnp.float32)
    params = init_params(k_params, obs_dim, hidden_sizes, act_dim)
    prepared = prepare_params(params)

    # bf16 MXU matmuls vs f32 HIGHEST reference -> slightly loosened tolerance.
    ATOL = RTOL = 2e-2

    # Stochastic path (rsample).
    pi_action, logp_pi = squashed_gaussian_actor(
        obs, eps, prepared, act_limit=act_limit, deterministic=False)
    jax.block_until_ready((pi_action, logp_pi))
    assert pi_action.shape == (batch, act_dim)
    assert logp_pi.shape == (batch,)
    pi_ref, logp_ref = _reference(obs, eps, params, act_limit, False)
    assert bool(jnp.allclose(pi_action, pi_ref, atol=ATOL, rtol=RTOL))
    assert bool(jnp.allclose(logp_pi, logp_ref, atol=ATOL, rtol=RTOL))

    # Deterministic path (eps dropped from the kernel entirely).
    pi_det, logp_det = squashed_gaussian_actor(
        obs, None, prepared, act_limit=act_limit, deterministic=True)
    jax.block_until_ready((pi_det, logp_det))
    pi_dref, logp_dref = _reference(obs, eps, params, act_limit, True)
    assert bool(jnp.allclose(pi_det, pi_dref, atol=ATOL, rtol=RTOL))
    assert bool(jnp.allclose(logp_det, logp_dref, atol=ATOL, rtol=RTOL))

    assert bool(jnp.all(jnp.isfinite(pi_action)))
    assert bool(jnp.all(jnp.isfinite(logp_pi)))
    print("KERNEL_OK")
</pallas_src>

<mosaic_0001>
module attributes {stable_mosaic.version = 11 : i64} {
  func.func @_actor_kernel(%arg0: i32, %arg1: memref<8x16xf32, #tpu.memory_space<vmem>>, %arg2: memref<8x8xf32, #tpu.memory_space<vmem>>, %arg3: memref<16x32xbf16, #tpu.memory_space<vmem>>, %arg4: memref<1x32xf32, #tpu.memory_space<vmem>>, %arg5: memref<32x32xbf16, #tpu.memory_space<vmem>>, %arg6: memref<1x32xf32, #tpu.memory_space<vmem>>, %arg7: memref<32x256xbf16, #tpu.memory_space<vmem>>, %arg8: memref<1x256xf32, #tpu.memory_space<vmem>>, %arg9: memref<8x8xf32, #tpu.memory_space<vmem>>, %arg10: memref<8x1xf32, #tpu.memory_space<vmem>>) attributes {dimension_semantics = [#tpu.dimension_semantics<parallel>], iteration_bounds = array<i64: 1>, scalar_prefetch = 0 : i64, scratch_operands = 0 : i64, tpu.core_type = #tpu.core_type<tc>, window_params = [{transform_indices = @transform_0, window_bounds = array<i64: 8, 16>}, {transform_indices = @transform_1, window_bounds = array<i64: 8, 8>}, {pipeline_mode = #tpu.pipeline_mode<synchronous>, transform_indices = @transform_2, window_bounds = array<i64: 16, 32>}, {pipeline_mode = #tpu.pipeline_mode<synchronous>, transform_indices = @transform_3, window_bounds = array<i64: 1, 32>}, {pipeline_mode = #tpu.pipeline_mode<synchronous>, transform_indices = @transform_4, window_bounds = array<i64: 32, 32>}, {pipeline_mode = #tpu.pipeline_mode<synchronous>, transform_indices = @transform_5, window_bounds = array<i64: 1, 32>}, {pipeline_mode = #tpu.pipeline_mode<synchronous>, transform_indices = @transform_6, window_bounds = array<i64: 32, 256>}, {pipeline_mode = #tpu.pipeline_mode<synchronous>, transform_indices = @transform_7, window_bounds = array<i64: 1, 256>}, {transform_indices = @transform_8, window_bounds = array<i64: 8, 8>}, {transform_indices = @transform_9, window_bounds = array<i64: 8, 1>}]} {
    %c0 = arith.constant 0 : index
    %c0_0 = arith.constant 0 : index
    %0 = vector.load %arg2[%c0, %c0_0] : memref<8x8xf32, #tpu.memory_space<vmem>>, vector<8x8xf32>
    %c0_1 = arith.constant 0 : index
    %c0_2 = arith.constant 0 : index
    %1 = vector.load %arg1[%c0_1, %c0_2] : memref<8x16xf32, #tpu.memory_space<vmem>>, vector<8x16xf32>
    %2 = arith.truncf %1 : vector<8x16xf32> to vector<8x16xbf16>
    %c0_3 = arith.constant 0 : index
    %c0_4 = arith.constant 0 : index
    %3 = vector.load %arg3[%c0_3, %c0_4] : memref<16x32xbf16, #tpu.memory_space<vmem>>, vector<16x32xbf16>
    %cst = arith.constant dense<0.000000e+00> : vector<8x32xf32>
    %4 = tpu.matmul %2, %3, %cst {dimension_numbers = #tpu.dot_dimension_numbers<[1], [0], [0], [1], [0, 0, 1, 1], [], []>} : vector<8x16xbf16>, vector<16x32xbf16>, vector<8x32xf32> -> vector<8x32xf32>
    %c0_5 = arith.constant 0 : index
    %c0_6 = arith.constant 0 : index
    %5 = vector.load %arg4[%c0_5, %c0_6] : memref<1x32xf32, #tpu.memory_space<vmem>>, vector<1x32xf32>
    %6 = vector.broadcast %5 : vector<1x32xf32> to vector<8x32xf32>
    %7 = arith.addf %4, %6 : vector<8x32xf32>
    %cst_7 = arith.constant 0.000000e+00 : f32
    %8 = vector.broadcast %cst_7 : f32 to vector<8x32xf32>
    %9 = arith.maximumf %7, %8 : vector<8x32xf32>
    %10 = arith.truncf %9 : vector<8x32xf32> to vector<8x32xbf16>
    %c0_8 = arith.constant 0 : index
    %c0_9 = arith.constant 0 : index
    %11 = vector.load %arg5[%c0_8, %c0_9] : memref<32x32xbf16, #tpu.memory_space<vmem>>, vector<32x32xbf16>
    %cst_10 = arith.constant dense<0.000000e+00> : vector<8x32xf32>
    %12 = tpu.matmul %10, %11, %cst_10 {dimension_numbers = #tpu.dot_dimension_numbers<[1], [0], [0], [1], [0, 0, 1, 1], [], []>} : vector<8x32xbf16>, vector<32x32xbf16>, vector<8x32xf32> -> vector<8x32xf32>
    %c0_11 = arith.constant 0 : index
    %c0_12 = arith.constant 0 : index
    %13 = vector.load %arg6[%c0_11, %c0_12] : memref<1x32xf32, #tpu.memory_space<vmem>>, vector<1x32xf32>
    %14 = vector.broadcast %13 : vector<1x32xf32> to vector<8x32xf32>
    %15 = arith.addf %12, %14 : vector<8x32xf32>
    %cst_13 = arith.constant 0.000000e+00 : f32
    %16 = vector.broadcast %cst_13 : f32 to vector<8x32xf32>
    %17 = arith.maximumf %15, %16 : vector<8x32xf32>
    %18 = arith.truncf %17 : vector<8x32xf32> to vector<8x32xbf16>
    %c0_14 = arith.constant 0 : index
    %c0_15 = arith.constant 0 : index
    %19 = vector.load %arg7[%c0_14, %c0_15] : memref<32x256xbf16, #tpu.memory_space<vmem>>, vector<32x256xbf16>
    %cst_16 = arith.constant dense<0.000000e+00> : vector<8x256xf32>
    %20 = tpu.matmul %18, %19, %cst_16 {dimension_numbers = #tpu.dot_dimension_numbers<[1], [0], [0], [1], [0, 0, 1, 1], [], []>} : vector<8x32xbf16>, vector<32x256xbf16>, vector<8x256xf32> -> vector<8x256xf32>
    %c0_17 = arith.constant 0 : index
    %c0_18 = arith.constant 0 : index
    %21 = vector.load %arg8[%c0_17, %c0_18] : memref<1x256xf32, #tpu.memory_space<vmem>>, vector<1x256xf32>
    %22 = vector.broadcast %21 : vector<1x256xf32> to vector<8x256xf32>
    %23 = arith.addf %20, %22 : vector<8x256xf32>
    %24 = vector.extract_strided_slice %23 {offsets = [0, 0], sizes = [8, 8], strides = [1, 1]} : vector<8x256xf32> to vector<8x8xf32>
    %25 = vector.extract_strided_slice %23 {offsets = [0, 128], sizes = [8, 8], strides = [1, 1]} : vector<8x256xf32> to vector<8x8xf32>
    %cst_19 = arith.constant -2.000000e+01 : f32
    %cst_20 = arith.constant 2.000000e+00 : f32
    %26 = vector.broadcast %cst_19 : f32 to vector<8x8xf32>
    %27 = arith.maximumf %26, %25 : vector<8x8xf32>
    %28 = vector.broadcast %cst_20 : f32 to vector<8x8xf32>
    %29 = arith.minimumf %28, %27 : vector<8x8xf32>
    %30 = math.exp %29 : vector<8x8xf32>
    %31 = arith.mulf %30, %0 : vector<8x8xf32>
    %32 = arith.addf %24, %31 : vector<8x8xf32>
    %cst_21 = arith.constant 5.000000e-01 : f32
    %33 = vector.broadcast %cst_21 : f32 to vector<8x8xf32>
    %34 = arith.mulf %33, %0 : vector<8x8xf32>
    %35 = arith.mulf %34, %0 : vector<8x8xf32>
    %36 = math.absf %32 : vector<8x8xf32>
    %cst_22 = arith.constant -2.000000e+00 : f32
    %37 = vector.broadcast %cst_22 : f32 to vector<8x8xf32>
    %38 = arith.mulf %37, %36 : vector<8x8xf32>
    %39 = math.exp %38 : vector<8x8xf32>
    %cst_23 = arith.constant -2.000000e+00 : f32
    %40 = vector.broadcast %cst_23 : f32 to vector<8x8xf32>
    %41 = arith.mulf %40, %32 : vector<8x8xf32>
    %cst_24 = arith.constant 0.000000e+00 : f32
    %42 = vector.broadcast %cst_24 : f32 to vector<8x8xf32>
    %43 = arith.maximumf %41, %42 : vector<8x8xf32>
    %44 = math.log1p %39 : vector<8x8xf32>
    %45 = arith.addf %43, %44 : vector<8x8xf32>
    %cst_25 = arith.constant 0.000000e+00 : f32
    %46 = vector.broadcast %cst_25 : f32 to vector<8x8xf32>
    %47 = arith.subf %46, %35 : vector<8x8xf32>
    %48 = arith.subf %47, %29 : vector<8x8xf32>
    %cst_26 = arith.constant 0.918938517 : f32
    %49 = vector.broadcast %cst_26 : f32 to vector<8x8xf32>
    %50 = arith.subf %48, %49 : vector<8x8xf32>
    %cst_27 = arith.constant 0.693147182 : f32
    %51 = vector.broadcast %cst_27 : f32 to vector<8x8xf32>
    %52 = arith.subf %51, %32 : vector<8x8xf32>
    %53 = arith.subf %52, %45 : vector<8x8xf32>
    %cst_28 = arith.constant 2.000000e+00 : f32
    %54 = vector.broadcast %cst_28 : f32 to vector<8x8xf32>
    %55 = arith.mulf %54, %53 : vector<8x8xf32>
    %56 = arith.subf %50, %55 : vector<8x8xf32>
    %cst_29 = arith.constant dense<0.000000e+00> : vector<8xf32>
    %57 = vector.multi_reduction <add>, %56, %cst_29 [1] : vector<8x8xf32> to vector<8xf32>
    %58 = vector.shape_cast %57 : vector<8xf32> to vector<8x1xf32>
    %c0_30 = arith.constant 0 : index
    %c0_31 = arith.constant 0 : index
    %59 = vector.load %arg10[%c0_30, %c0_31] : memref<8x1xf32, #tpu.memory_space<vmem>>, vector<8x1xf32>
    tpu.vector_store %arg10[%c0_30, %c0_31], %58 {strides = array<i32>} : memref<8x1xf32, #tpu.memory_space<vmem>>, vector<8x1xf32>,
    %cst_32 = arith.constant 1.000000e+00 : f32
    %60 = vector.broadcast %cst_32 : f32 to vector<8x8xf32>
    %61 = arith.subf %60, %39 : vector<8x8xf32>
    %cst_33 = arith.constant 1.000000e+00 : f32
    %62 = vector.broadcast %cst_33 : f32 to vector<8x8xf32>
    %63 = arith.addf %62, %39 : vector<8x8xf32>
    %64 = tpu.reciprocal %63 {approx = true} : vector<8x8xf32> -> vector<8x8xf32>
    %65 = arith.mulf %61, %64 : vector<8x8xf32>
    %cst_34 = arith.constant 0.000000e+00 : f32
    %66 = vector.broadcast %cst_34 : f32 to vector<8x8xf32>
    %67 = arith.cmpf oge, %32, %66 : vector<8x8xf32>
    %cst_35 = arith.constant 0.000000e+00 : f32
    %68 = vector.broadcast %cst_35 : f32 to vector<8x8xf32>
    %69 = arith.subf %68, %65 : vector<8x8xf32>
    %70 = arith.select %67, %65, %69 : vector<8x8xi1>, vector<8x8xf32>
    %cst_36 = arith.constant 1.000000e+00 : f32
    %71 = vector.broadcast %cst_36 : f32 to vector<8x8xf32>
    %72 = arith.mulf %71, %70 : vector<8x8xf32>
    %c0_37 = arith.constant 0 : index
    %c0_38 = arith.constant 0 : index
    %73 = vector.load %arg9[%c0_37, %c0_38] : memref<8x8xf32, #tpu.memory_space<vmem>>, vector<8x8xf32>
    tpu.vector_store %arg9[%c0_37, %c0_38], %72 {strides = array<i32>} : memref<8x8xf32, #tpu.memory_space<vmem>>, vector<8x8xf32>,
    return
  }
  func.func @transform_0(%arg0: i32) -> (i32, i32) {
    %c0_i32 = arith.constant 0 : i32
    %c0_i32_0 = arith.constant 0 : i32
    return %arg0, %c0_i32 : i32, i32
  }
  func.func @transform_1(%arg0: i32) -> (i32, i32) {
    %c0_i32 = arith.constant 0 : i32
    %c0_i32_0 = arith.constant 0 : i32
    return %arg0, %c0_i32 : i32, i32
  }
  func.func @transform_2(%arg0: i32) -> (i32, i32) {
    %c0_i32 = arith.constant 0 : i32
    %c0_i32_0 = arith.constant 0 : i32
    %c0_i32_1 = arith.constant 0 : i32
    return %c0_i32, %c0_i32_0 : i32, i32
  }
  func.func @transform_3(%arg0: i32) -> (i32, i32) {
    %c0_i32 = arith.constant 0 : i32
    %c0_i32_0 = arith.constant 0 : i32
    %c0_i32_1 = arith.constant 0 : i32
    return %c0_i32, %c0_i32_0 : i32, i32
  }
  func.func @transform_4(%arg0: i32) -> (i32, i32) {
    %c0_i32 = arith.constant 0 : i32
    %c0_i32_0 = arith.constant 0 : i32
    %c0_i32_1 = arith.constant 0 : i32
    return %c0_i32, %c0_i32_0 : i32, i32
  }
  func.func @transform_5(%arg0: i32) -> (i32, i32) {
    %c0_i32 = arith.constant 0 : i32
    %c0_i32_0 = arith.constant 0 : i32
    %c0_i32_1 = arith.constant 0 : i32
    return %c0_i32, %c0_i32_0 : i32, i32
  }
  func.func @transform_6(%arg0: i32) -> (i32, i32) {
    %c0_i32 = arith.constant 0 : i32
    %c0_i32_0 = arith.constant 0 : i32
    %c0_i32_1 = arith.constant 0 : i32
    return %c0_i32, %c0_i32_0 : i32, i32
  }
  func.func @transform_7(%arg0: i32) -> (i32, i32) {
    %c0_i32 = arith.constant 0 : i32
    %c0_i32_0 = arith.constant 0 : i32
    %c0_i32_1 = arith.constant 0 : i32
    return %c0_i32, %c0_i32_0 : i32, i32
  }
  func.func @transform_8(%arg0: i32) -> (i32, i32) {
    %c0_i32 = arith.constant 0 : i32
    %c0_i32_0 = arith.constant 0 : i32
    return %arg0, %c0_i32 : i32, i32
  }
  func.func @transform_9(%arg0: i32) -> (i32, i32) {
    %c0_i32 = arith.constant 0 : i32
    %c0_i32_0 = arith.constant 0 : i32
    return %arg0, %c0_i32 : i32, i32
  }
}

module attributes {stable_mosaic.version = 11 : i64} {
  func.func @_actor_kernel(%arg0: i32, %arg1: memref<8x16xf32, #tpu.memory_space<vmem>>, %arg2: memref<8x8xf32, #tpu.memory_space<vmem>>, %arg3: memref<16x32xbf16, #tpu.memory_space<vmem>>, %arg4: memref<1x32xf32, #tpu.memory_space<vmem>>, %arg5: memref<32x32xbf16, #tpu.memory_space<vmem>>, %arg6: memref<1x32xf32, #tpu.memory_space<vmem>>, %arg7: memref<32x256xbf16, #tpu.memory_space<vmem>>, %arg8: memref<1x256xf32, #tpu.memory_space<vmem>>, %arg9: memref<8x8xf32, #tpu.memory_space<vmem>>, %arg10: memref<8x1xf32, #tpu.memory_space<vmem>>) attributes {dimension_semantics = [#tpu.dimension_semantics<parallel>], iteration_bounds = array<i64: 1>, scalar_prefetch = 0 : i64, scratch_operands = 0 : i64, tpu.core_type = #tpu.core_type<tc>, window_params = [{transform_indices = @transform_0, window_bounds = array<i64: 8, 16>}, {transform_indices = @transform_1, window_bounds = array<i64: 8, 8>}, {pipeline_mode = #tpu.pipeline_mode<synchronous>, transform_indices = @transform_2, window_bounds = array<i64: 16, 32>}, {pipeline_mode = #tpu.pipeline_mode<synchronous>, transform_indices = @transform_3, window_bounds = array<i64: 1, 32>}, {pipeline_mode = #tpu.pipeline_mode<synchronous>, transform_indices = @transform_4, window_bounds = array<i64: 32, 32>}, {pipeline_mode = #tpu.pipeline_mode<synchronous>, transform_indices = @transform_5, window_bounds = array<i64: 1, 32>}, {pipeline_mode = #tpu.pipeline_mode<synchronous>, transform_indices = @transform_6, window_bounds = array<i64: 32, 256>}, {pipeline_mode = #tpu.pipeline_mode<synchronous>, transform_indices = @transform_7, window_bounds = array<i64: 1, 256>}, {transform_indices = @transform_8, window_bounds = array<i64: 8, 8>}, {transform_indices = @transform_9, window_bounds = array<i64: 8, 1>}]} {
    %c0 = arith.constant 0 : index
    %c0_0 = arith.constant 0 : index
    %0 = vector.load %arg2[%c0, %c0_0] : memref<8x8xf32, #tpu.memory_space<vmem>>, vector<8x8xf32>
    %c0_1 = arith.constant 0 : index
    %c0_2 = arith.constant 0 : index
    %1 = vector.load %arg1[%c0_1, %c0_2] : memref<8x16xf32, #tpu.memory_space<vmem>>, vector<8x16xf32>
    %2 = arith.truncf %1 : vector<8x16xf32> to vector<8x16xbf16>
    %c0_3 = arith.constant 0 : index
    %c0_4 = arith.constant 0 : index
    %3 = vector.load %arg3[%c0_3, %c0_4] : memref<16x32xbf16, #tpu.memory_space<vmem>>, vector<16x32xbf16>
    %cst = arith.constant dense<0.000000e+00> : vector<8x32xf32>
    %4 = tpu.matmul %2, %3, %cst {dimension_numbers = #tpu.dot_dimension_numbers<[1], [0], [0], [1], [0, 0, 1, 1], [], []>} : vector<8x16xbf16>, vector<16x32xbf16>, vector<8x32xf32> -> vector<8x32xf32>
    %c0_5 = arith.constant 0 : index
    %c0_6 = arith.constant 0 : index
    %5 = vector.load %arg4[%c0_5, %c0_6] : memref<1x32xf32, #tpu.memory_space<vmem>>, vector<1x32xf32>
    %6 = vector.broadcast %5 : vector<1x32xf32> to vector<8x32xf32>
    %7 = arith.addf %4, %6 : vector<8x32xf32>
    %cst_7 = arith.constant 0.000000e+00 : f32
    %8 = vector.broadcast %cst_7 : f32 to vector<8x32xf32>
    %9 = arith.maximumf %7, %8 : vector<8x32xf32>
    %10 = arith.truncf %9 : vector<8x32xf32> to vector<8x32xbf16>
    %c0_8 = arith.constant 0 : index
    %c0_9 = arith.constant 0 : index
    %11 = vector.load %arg5[%c0_8, %c0_9] : memref<32x32xbf16, #tpu.memory_space<vmem>>, vector<32x32xbf16>
    %cst_10 = arith.constant dense<0.000000e+00> : vector<8x32xf32>
    %12 = tpu.matmul %10, %11, %cst_10 {dimension_numbers = #tpu.dot_dimension_numbers<[1], [0], [0], [1], [0, 0, 1, 1], [], []>} : vector<8x32xbf16>, vector<32x32xbf16>, vector<8x32xf32> -> vector<8x32xf32>
    %c0_11 = arith.constant 0 : index
    %c0_12 = arith.constant 0 : index
    %13 = vector.load %arg6[%c0_11, %c0_12] : memref<1x32xf32, #tpu.memory_space<vmem>>, vector<1x32xf32>
    %14 = vector.broadcast %13 : vector<1x32xf32> to vector<8x32xf32>
    %15 = arith.addf %12, %14 : vector<8x32xf32>
    %cst_13 = arith.constant 0.000000e+00 : f32
    %16 = vector.broadcast %cst_13 : f32 to vector<8x32xf32>
    %17 = arith.maximumf %15, %16 : vector<8x32xf32>
    %18 = arith.truncf %17 : vector<8x32xf32> to vector<8x32xbf16>
    %c0_14 = arith.constant 0 : index
    %c0_15 = arith.constant 0 : index
    %19 = vector.load %arg7[%c0_14, %c0_15] : memref<32x256xbf16, #tpu.memory_space<vmem>>, vector<32x256xbf16>
    %cst_16 = arith.constant dense<0.000000e+00> : vector<8x256xf32>
    %20 = tpu.matmul %18, %19, %cst_16 {dimension_numbers = #tpu.dot_dimension_numbers<[1], [0], [0], [1], [0, 0, 1, 1], [], []>} : vector<8x32xbf16>, vector<32x256xbf16>, vector<8x256xf32> -> vector<8x256xf32>
    %c0_17 = arith.constant 0 : index
    %c0_18 = arith.constant 0 : index
    %21 = vector.load %arg8[%c0_17, %c0_18] : memref<1x256xf32, #tpu.memory_space<vmem>>, vector<1x256xf32>
    %22 = vector.broadcast %21 : vector<1x256xf32> to vector<8x256xf32>
    %23 = arith.addf %20, %22 : vector<8x256xf32>
    %24 = vector.extract_strided_slice %23 {offsets = [0, 0], sizes = [8, 8], strides = [1, 1]} : vector<8x256xf32> to vector<8x8xf32>
    %25 = vector.extract_strided_slice %23 {offsets = [0, 128], sizes = [8, 8], strides = [1, 1]} : vector<8x256xf32> to vector<8x8xf32>
    %cst_19 = arith.constant -2.000000e+01 : f32
    %cst_20 = arith.constant 2.000000e+00 : f32
    %26 = vector.broadcast %cst_19 : f32 to vector<8x8xf32>
    %27 = arith.maximumf %26, %25 : vector<8x8xf32>
    %28 = vector.broadcast %cst_20 : f32 to vector<8x8xf32>
    %29 = arith.minimumf %28, %27 : vector<8x8xf32>
    %30 = math.exp %29 : vector<8x8xf32>
    %31 = arith.mulf %30, %0 : vector<8x8xf32>
    %32 = arith.addf %24, %31 : vector<8x8xf32>
    %cst_21 = arith.constant 5.000000e-01 : f32
    %33 = vector.broadcast %cst_21 : f32 to vector<8x8xf32>
    %34 = arith.mulf %33, %0 : vector<8x8xf32>
    %35 = arith.mulf %34, %0 : vector<8x8xf32>
    %36 = math.absf %32 : vector<8x8xf32>
    %cst_22 = arith.constant -2.000000e+00 : f32
    %37 = vector.broadcast %cst_22 : f32 to vector<8x8xf32>
    %38 = arith.mulf %37, %36 : vector<8x8xf32>
    %39 = math.exp %38 : vector<8x8xf32>
    %cst_23 = arith.constant -2.000000e+00 : f32
    %40 = vector.broadcast %cst_23 : f32 to vector<8x8xf32>
    %41 = arith.mulf %40, %32 : vector<8x8xf32>
    %cst_24 = arith.constant 0.000000e+00 : f32
    %42 = vector.broadcast %cst_24 : f32 to vector<8x8xf32>
    %43 = arith.maximumf %41, %42 : vector<8x8xf32>
    %44 = math.log1p %39 : vector<8x8xf32>
    %45 = arith.addf %43, %44 : vector<8x8xf32>
    %cst_25 = arith.constant 0.000000e+00 : f32
    %46 = vector.broadcast %cst_25 : f32 to vector<8x8xf32>
    %47 = arith.subf %46, %35 : vector<8x8xf32>
    %48 = arith.subf %47, %29 : vector<8x8xf32>
    %cst_26 = arith.constant 0.918938517 : f32
    %49 = vector.broadcast %cst_26 : f32 to vector<8x8xf32>
    %50 = arith.subf %48, %49 : vector<8x8xf32>
    %cst_27 = arith.constant 0.693147182 : f32
    %51 = vector.broadcast %cst_27 : f32 to vector<8x8xf32>
    %52 = arith.subf %51, %32 : vector<8x8xf32>
    %53 = arith.subf %52, %45 : vector<8x8xf32>
    %cst_28 = arith.constant 2.000000e+00 : f32
    %54 = vector.broadcast %cst_28 : f32 to vector<8x8xf32>
    %55 = arith.mulf %54, %53 : vector<8x8xf32>
    %56 = arith.subf %50, %55 : vector<8x8xf32>
    %cst_29 = arith.constant dense<0.000000e+00> : vector<8xf32>
    %57 = vector.multi_reduction <add>, %56, %cst_29 [1] : vector<8x8xf32> to vector<8xf32>
    %58 = vector.shape_cast %57 : vector<8xf32> to vector<8x1xf32>
    %c0_30 = arith.constant 0 : index
    %c0_31 = arith.constant 0 : index
    %59 = vector.load %arg10[%c0_30, %c0_31] : memref<8x1xf32, #tpu.memory_space<vmem>>, vector<8x1xf32>
    tpu.vector_store %arg10[%c0_30, %c0_31], %58 {strides = array<i32>} : memref<8x1xf32, #tpu.memory_space<vmem>>, vector<8x1xf32>,
    %cst_32 = arith.constant 1.000000e+00 : f32
    %60 = vector.broadcast %cst_32 : f32 to vector<8x8xf32>
    %61 = arith.subf %60, %39 : vector<8x8xf32>
    %cst_33 = arith.constant 1.000000e+00 : f32
    %62 = vector.broadcast %cst_33 : f32 to vector<8x8xf32>
    %63 = arith.addf %62, %39 : vector<8x8xf32>
    %64 = tpu.reciprocal %63 {approx = true} : vector<8x8xf32> -> vector<8x8xf32>
    %65 = arith.mulf %61, %64 : vector<8x8xf32>
    %cst_34 = arith.constant 0.000000e+00 : f32
    %66 = vector.broadcast %cst_34 : f32 to vector<8x8xf32>
    %67 = arith.cmpf oge, %32, %66 : vector<8x8xf32>
    %cst_35 = arith.constant 0.000000e+00 : f32
    %68 = vector.broadcast %cst_35 : f32 to vector<8x8xf32>
    %69 = arith.subf %68, %65 : vector<8x8xf32>
    %70 = arith.select %67, %65, %69 : vector<8x8xi1>, vector<8x8xf32>
    %cst_36 = arith.constant 1.000000e+00 : f32
    %71 = vector.broadcast %cst_36 : f32 to vector<8x8xf32>
    %72 = arith.mulf %71, %70 : vector<8x8xf32>
    %c0_37 = arith.constant 0 : index
    %c0_38 = arith.constant 0 : index
    %73 = vector.load %arg9[%c0_37, %c0_38] : memref<8x8xf32, #tpu.memory_space<vmem>>, vector<8x8xf32>
    tpu.vector_store %arg9[%c0_37, %c0_38], %72 {strides = array<i32>} : memref<8x8xf32, #tpu.memory_space<vmem>>, vector<8x8xf32>,
    return
  }
  func.func @transform_0(%arg0: i32) -> (i32, i32) {
    %c0_i32 = arith.constant 0 : i32
    %c0_i32_0 = arith.constant 0 : i32
    return %arg0, %c0_i32 : i32, i32
  }
  func.func @transform_1(%arg0: i32) -> (i32, i32) {
    %c0_i32 = arith.constant 0 : i32
    %c0_i32_0 = arith.constant 0 : i32
    return %arg0, %c0_i32 : i32, i32
  }
  func.func @transform_2(%arg0: i32) -> (i32, i32) {
    %c0_i32 = arith.constant 0 : i32
    %c0_i32_0 = arith.constant 0 : i32
    %c0_i32_1 = arith.constant 0 : i32
    return %c0_i32, %c0_i32_0 : i32, i32
  }
  func.func @transform_3(%arg0: i32) -> (i32, i32) {
    %c0_i32 = arith.constant 0 : i32
    %c0_i32_0 = arith.constant 0 : i32
    %c0_i32_1 = arith.constant 0 : i32
    return %c0_i32, %c0_i32_0 : i32, i32
  }
  func.func @transform_4(%arg0: i32) -> (i32, i32) {
    %c0_i32 = arith.constant 0 : i32
    %c0_i32_0 = arith.constant 0 : i32
    %c0_i32_1 = arith.constant 0 : i32
    return %c0_i32, %c0_i32_0 : i32, i32
  }
  func.func @transform_5(%arg0: i32) -> (i32, i32) {
    %c0_i32 = arith.constant 0 : i32
    %c0_i32_0 = arith.constant 0 : i32
    %c0_i32_1 = arith.constant 0 : i32
    return %c0_i32, %c0_i32_0 : i32, i32
  }
  func.func @transform_6(%arg0: i32) -> (i32, i32) {
    %c0_i32 = arith.constant 0 : i32
    %c0_i32_0 = arith.constant 0 : i32
    %c0_i32_1 = arith.constant 0 : i32
    return %c0_i32, %c0_i32_0 : i32, i32
  }
  func.func @transform_7(%arg0: i32) -> (i32, i32) {
    %c0_i32 = arith.constant 0 : i32
    %c0_i32_0 = arith.constant 0 : i32
    %c0_i32_1 = arith.constant 0 : i32
    return %c0_i32, %c0_i32_0 : i32, i32
  }
  func.func @transform_8(%arg0: i32) -> (i32, i32) {
    %c0_i32 = arith.constant 0 : i32
    %c0_i32_0 = arith.constant 0 : i32
    return %arg0, %c0_i32 : i32, i32
  }
  func.func @transform_9(%arg0: i32) -> (i32, i32) {
    %c0_i32 = arith.constant 0 : i32
    %c0_i32_0 = arith.constant 0 : i32
    return %arg0, %c0_i32 : i32, i32
  }
}

</mosaic_0001>

<bundles_post_ra>
// kernel: tpu_custom_call.1
= control target key start
LH: loop header
LB: loop body
LE: loop exit
PB: predicated region body
PF: predicated region fallthrough
CT: control target
= control target key end

     0   :  { %15 = vsyncpa [#allocation3], 0  ;;  %s661_s0 = inlined_call_operand.hbm [shape: f32[8,16], index: 0, kind: input, shape index: {}]   ;;  %s662_s1 = inlined_call_operand.hbm [shape: f32[8,8], index: 1, kind: input, shape index: {}]   ;;  %s663_s2 = inlined_call_operand.hbm [shape: bf16[16,32], index: 2, kind: input, shape index: {}]   ;;  %s664_s3 = inlined_call_operand.vmem [shape: f32[1,32], index: 3, kind: input, shape index: {}]   ;;  %s665_s4 = inlined_call_operand.hbm [shape: bf16[32,32], index: 4, kind: input, shape index: {}]   ;;  %s666_s5 = inlined_call_operand.vmem [shape: f32[1,32], index: 5, kind: input, shape index: {}]   ;;  %s667_s6 = inlined_call_operand.hbm [shape: bf16[32,256], index: 6, kind: input, shape index: {}]   ;;  %s668_s7 = inlined_call_operand.vmem [shape: f32[1,256], index: 7, kind: input, shape index: {}]   ;;  %s669_s8 = inlined_call_operand.hbm [shape: f32[8,8], index: 8, kind: output, shape index: {0}]   ;;  %s670_s9 = inlined_call_operand.vmem [shape: f32[8,1], index: 9, kind: output, shape index: {1}]  }
   0x1   :  { %16 = vsyncpa [#allocation6], 0 }
   0x2   :  { %17 = vsyncpa [#allocation9], 0 }
   0x3   :  { %18 = vsyncpa [#allocation4], 0  ;;  %s566_s30 = smov [#allocation5]  }
   0x4   :  { %s35_s10 = sshll.u32 %s566_s30, 4  ;;  %s36_s10 = int_to_ptr.vmem [resolvable:$true] %s35_s10 }
   0x5   :  { %s446_s11 = scalar_lea.vmem %s36_s10, 128  ;;  %p451_p1 = scmp.lt.s32.totalorder %s36_s10, %s36_s10 }
   0x6   :  { %p447_p0 = scmp.ne.s32.totalorder %s36_s10, %s446_s11  ;;  %p452_p2 = scmp.lt.s32.totalorder %s446_s11, %s446_s11 }
   0x8   :  { %p453_p3 = por %p452_p2, %p451_p1 }
   0xa   :  { %p454_p4 = pnand %p453_p3, %p447_p0 }
   0xc   :  { %457 = shalt.err (!%p454_p4)
}
   0xd   :  { %38 = dma.hbm_to_vmem [thread:$0]  %s662_s1, 128, %s36_s10, [#allocation6]  }
   0xe   :  { %s567_s14 = smov [#allocation8]   ;;  %s568_s16 = smov [#allocation2]  }
   0xf   :  { %s58_s15 = sshll.u32 %s567_s14, 4  ;;  %s25_s17 = sshll.u32 %s568_s16, 4  ;;  %s59_s15 = int_to_ptr.vmem [resolvable:$true] %s58_s15  ;;  %s26_s17 = int_to_ptr.vmem [resolvable:$true] %s25_s17 }
  0x10   :  { %s466_s18 = scalar_lea.vmem %s59_s15, 256  ;;  %p471_p6 = scmp.lt.s32.totalorder %s59_s15, %s59_s15 }
  0x11   :  { %p467_p5 = scmp.ne.s32.totalorder %s59_s15, %s466_s18  ;;  %p472_p7 = scmp.lt.s32.totalorder %s466_s18, %s466_s18 }
  0x13   :  { %p473_p8 = por %p472_p7, %p471_p6 }
  0x15   :  { %p474_p9 = pnand %p473_p8, %p467_p5 }
  0x17   :  { %477 = shalt.err (!%p474_p9)
}
  0x18   :  { %s569_s19 = smov 64   ;;  %s570_s20 = smov 4  }
  0x19   :  { %64 = dma.hbm_to_vmem [thread:$0]  %s665_s4, 256, %s59_s15, [#allocation9], %s569_s19, %s569_s19, %s570_s20  }
  0x1a   :  { %s486_s1 = scalar_lea.vmem %s26_s17, 128  ;;  %p491_p11 = scmp.lt.s32.totalorder %s26_s17, %s26_s17 }
  0x1b   :  { %p487_p10 = scmp.ne.s32.totalorder %s26_s17, %s486_s1  ;;  %p492_p12 = scmp.lt.s32.totalorder %s486_s1, %s486_s1 }
  0x1d   :  { %p493_p13 = por %p492_p12, %p491_p11 }
  0x1f   :  { %p494_p0 = pnand %p493_p13, %p487_p10 }
  0x21   :  { %497 = shalt.err (!%p494_p0)
}
  0x22   :  { %28 = dma.hbm_to_vmem [thread:$0]  %s661_s0, 128, %s26_s17, [#allocation3]  }
  0x23   :  { %s571_s25 = smov [#allocation7]   ;;  %s572_s27 = smov [#allocation10]  }
  0x24   :  { %s44_s26 = sshll.u32 %s571_s25, 4  ;;  %s72_s28 = sshll.u32 %s572_s27, 4  ;;  %s45_s26 = int_to_ptr.vmem [resolvable:$true] %s44_s26  ;;  %s73_s28 = int_to_ptr.vmem [resolvable:$true] %s72_s28 }
  0x25   :  { %s506_s29 = scalar_lea.vmem %s45_s26, 128  ;;  %p511_p2 = scmp.lt.s32.totalorder %s45_s26, %s45_s26 }
  0x26   :  { %p507_p1 = scmp.ne.s32.totalorder %s45_s26, %s506_s29  ;;  %p512_p3 = scmp.lt.s32.totalorder %s506_s29, %s506_s29 }
  0x28   :  { %p513_p4 = por %p512_p3, %p511_p2 }
  0x2a   :  { %p514_p5 = pnand %p513_p4, %p507_p1 }
  0x2c   :  { %517 = shalt.err (!%p514_p5)
}
  0x2d   :  { %50 = dma.hbm_to_vmem [thread:$0]  %s663_s2, 128, %s45_s26, [#allocation6], %s569_s19, %s569_s19, %s570_s20  }
  0x2e   :  { %s526_s10 = scalar_lea.vmem %s73_s28, 512  ;;  %p531_p7 = scmp.lt.s32.totalorder %s73_s28, %s73_s28 }
  0x2f   :  { %p527_p6 = scmp.ne.s32.totalorder %s73_s28, %s526_s10  ;;  %p532_p8 = scmp.lt.s32.totalorder %s526_s10, %s526_s10 }
  0x31   :  { %p533_p9 = por %p532_p8, %p531_p7 }
  0x33   :  { %p534_p10 = pnand %p533_p9, %p527_p6 }
  0x35   :  { %537 = shalt.err (!%p534_p10)
}
  0x36   :  { %s573_s0 = smov 128   ;;  %s574_s11 = smov 8  }
  0x37   :  { %78 = dma.hbm_to_vmem [thread:$0]  %s667_s6, 512, %s73_s28, [#allocation9], %s573_s0, %s573_s0, %s574_s11  }
  0x38   :  { %558 = dma.done.wait [#allocation3], 128  }
  0x39   :  { %559 = vsyncadd [#allocation3], 4294967168 }
  0x3a   :  { %560 = dma.done.wait [#allocation6], 256  }
  0x3b   :  { %561 = vsyncadd [#allocation6], 4294967040 }
  0x3c   :  { %562 = dma.done.wait [#allocation9], 768  }
  0x3d   :  { %563 = vsyncadd [#allocation9], 4294966528  ;;  %v575_v0 = vmov 0.0   ;;  %vm576_vm0 = vmmov 0   ;;  %v421_v1 = vld [vmem:[#allocation7] sm:$0xff]   ;;  %v98_v2 = vld [vmem:[#allocation2] sm:$0xff]  ;;  %v236_v27 = vlaneseq }
  0x3e   :  { %394 = vmatprep.subr.bf16.mxu0 %v575_v0  ;;  %396 = vmatprep.mubr.msk.bf16.mxu0 %vm576_vm0, %v575_v0  ;;  %vm115_vm1 = vcmask 130048   ;;  %v99_v3 = vpack.c.bf16 %v98_v2, %v98_v2  ;;  %v422_v4 = vld [vmem:[#allocation8 + $0x8] sm:$0xff]   ;;  %v423_v5 = vld [vmem:[#allocation8] sm:$0xff]   ;;  %vm184_vm2 = vcmask 261120   ;;  %v429_v16 = vld [vmem:[#allocation10 + $0x4] ss:$8 sps:$4 sm:$0xff]  }
  0x3f   :  { %400 = vmatprep.subr.bf16.mxu1 %v575_v0  ;;  %404 = vmatprep.mubr.msk.bf16.mxu1 %vm576_vm0, %v575_v0  ;;  %v424_v6 = vld [vmem:[#allocation10 + $0x10] ss:$8 sps:$4 sm:$0xff]   ;;  %v426_v7 = vld [vmem:[#allocation10 + $0x14] ss:$8 sps:$4 sm:$0xff]   ;;  %v427_v17 = vld [vmem:[#allocation10] ss:$8 sps:$4 sm:$0xff]  }
  0x40   :  { %395 = vmatpush3.bf16.msra.mxu0 %v421_v1  ;;  %401 = vmatpush3.bf16.msra.mxu1 %v422_v4  ;;  %v376_v8 = vld [vmem:[%s664_s3] ss:$0 sm:$0xff]  ;;  %v577_v18 = vmov 0   ;;  %v237_v28 = vshrl.u32 %v236_v27, 7  ;;  %v97_v43 = vld [vmem:[#allocation5] sm:$0xff]  ;;  %vm341_vm4 = vcmask 64512  }
  0x41   :  { %402 = vmatprep.subr.bf16.mxu1 %v575_v0  ;;  %281 = vmatprep.subr.bf16.mxu0 %v426_v7  ;;  %v379_v19 = vld [vmem:[%s666_s5] ss:$0 sm:$0xff]  ;;  %v316_v52 = vmul.f32 0.5, %v97_v43  ;;  %s578_s5 = smov [#allocation11]  }
  0x42   :  { %v242_v29 = vsub.s32 1, %v237_v28  ;;  %v234_v30 = vld [vmem:[%s668_s7] sm:$0x3]  ;;  %v238_v40 = vsub.s32 0, %v237_v28  ;;  %s361_s7 = sshll.u32 %s578_s5, 4  ;;  %s362_s7 = int_to_ptr.vmem [resolvable:$true] %s361_s7 }
  0x43   :  { %397 = vmatmul.mubr.msk.bf16.vlgmr.msra.gmra.mxu0 %vm115_vm1, %v99_v3  ;;  %v317_v54 = vmul.f32 %v316_v52, %v97_v43  ;;  %s538_s17 = scalar_lea.vmem %s362_s7, 128  ;;  %p543_p12 = scmp.lt.s32.totalorder %s362_s7, %s362_s7 }
  0x44   :  { %403 = vmatpush3.bf16.msra.mxu1 %v423_v5  ;;  %282 = vmatpush1.bf16.msra.mxu0 %v424_v6  ;;  %v243_v31 = vrot.slane %v234_v30, %v242_v29  ;;  %v239_v41 = vrot.slane %v234_v30, %v238_v40  ;;  %p539_p11 = scmp.ne.s32.totalorder %s362_s7, %s538_s17  ;;  %p544_p13 = scmp.lt.s32.totalorder %s538_s17, %s538_s17 }
  0x45   :  { %283 = vmatprep.subr.bf16.mxu0 %v429_v16  ;;  %301 = vmatprep.mubr.bf16.mxu0 %v577_v18  ;;  %v334_v59 = vsub.f32 0.0, %v317_v54 }
  0x46   :  { %p545_p0 = por %p544_p13, %p543_p12 }
  0x48   :  { %284 = vmatpush1.bf16.msra.mxu0 %v427_v17  ;;  %p546_p1 = pnand %p545_p0, %p539_p11 }
 0x103   :  { %v153_v9 = vpop.f32.mrf.mxu0 }
 0x104   :  { %v154_v10 = vadd.f32 %v376_v8, %v153_v9 }
 0x105   :  { %v398_v11 = vpop.f32.mrf.mxu0 }
 0x106   :  { %v159_v12 = vmax.f32 %v154_v10, 0.0 }
 0x107   :  { %v156_v13 = vpop.f32.mrf.mxu0 }
 0x108   :  { %v160_v14 = vpack.c.bf16 %v159_v12, %v159_v12 }
 0x109   :  { %v399_v15 = vpop.f32.mrf.mxu0 }
 0x10a   :  { %405 = vmatmul.mubr.msk.bf16.vlgmr.msra.gmra.mxu1 %vm184_vm2, %v160_v14 }
 0x1ca   :  { %v222_v20 = vpop.f32.mrf.mxu1 }
 0x1cb   :  { %v223_v21 = vadd.f32 %v379_v19, %v222_v20 }
 0x1cc   :  { %v406_v22 = vpop.f32.mrf.mxu1 }
 0x1cd   :  { %v228_v23 = vmax.f32 %v223_v21, 0.0 }
 0x1ce   :  { %v225_v24 = vpop.f32.mrf.mxu1 }
 0x1cf   :  { %v229_v25 = vpack.c.bf16 %v228_v23, %v228_v23 }
 0x1d0   :  { %v407_v26 = vpop.f32.mrf.mxu1 }
 0x1d1   :  { %387 = vmatmul.mubr.msk.bf16.vlgmr.msra.gmra.mxu0 %vm184_vm2, %v229_v25 }
 0x291   :  { %v303_v32 = vpop.f32.mrf.mxu0 }
 0x292   :  { %v304_v44 = vadd.f32 %v303_v32, %v239_v41 }
 0x293   :  { %v305_v33 = vpop.f32.mrf.mxu0 }
 0x294   :  { %v306_v34 = vadd.f32 %v305_v33, %v243_v31 }
 0x295   :  { %v307_v35 = vpop.f32.mrf.mxu0 }
 0x296   :  { %v310_v36 = vmax.f32 %v306_v34, -20.0 }
 0x297   :  { %v308_v37 = vpop.f32.mrf.mxu0 }
 0x298   :  { %v311_v38 = vmin.f32 %v310_v36, 2.0 }
 0x29a   :  { %v312_v39 = vmul.f32 1.442695, %v311_v38  ;;  %v335_v3 = vsub.f32 %v334_v59, %v311_v38 }
 0x29c   :  { %430 = vpow2.f32 %v312_v39  ;;  %v388_v9 = vadd.f32 -0.9189385, %v335_v3 }
 0x2a9   :  { %v431_v42 = vpop.eup %430 }
 0x2aa   :  { %v314_v45 = vmul.f32 %v431_v42, %v97_v43 }
 0x2ac   :  { %v315_v46 = vadd.f32 %v314_v45, %v304_v44 }
 0x2ae   :  { %v318_v47 = vand.u32 2147483647, %v315_v46  ;;  %v322_v56 = vmul.f32 -2.0, %v315_v46  ;;  %v337_v5 = vsub.f32 0.6931472, %v315_v46  ;;  %vm351_vm5 = vcmp.ge.f32.partialorder %v315_v46, 0.0 }
 0x2b0   :  { %v319_v48 = vmul.f32 -2.0, %v318_v47  ;;  %v323_v0 = vmax.f32 %v322_v56, 0.0 }
 0x2b2   :  { %v320_v49 = vmul.f32 1.442695, %v319_v48 }
 0x2b4   :  { %432 = vpow2.f32 %v320_v49 }
 0x2c1   :  { %v433_v50 = vpop.eup %432 }
 0x2c2   :  { %v324_v51 = vadd.f32 1.0, %v433_v50  ;;  %v327_v53 = vmul.f32 -0.5, %v433_v50  ;;  %v330_v57 = vand.u32 2147483647, %v433_v50  ;;  %v347_v60 = vsub.f32 1.0, %v433_v50 }
 0x2c4   :  { %434 = vlog2.f32 %v324_v51  ;;  %v328_v55 = vadd.f32 1.0, %v327_v53  ;;  %vm331_vm3 = vcmp.lt.f32.partialorder %v330_v57, 0.0004427343 }
 0x2c5   :  { %436 = vrcp.f32 %v324_v51 }
 0x2c6   :  { %v329_v63 = vmul.f32 %v433_v50, %v328_v55 }
 0x2d1   :  { %v435_v58 = vpop.eup %434 }
 0x2d2   :  { %v437_v61 = vpop.eup %436  ;;  %v326_v62 = vmul.f32 0.6931472, %v435_v58 }
 0x2d3   :  { %v350_v1 = vmul.f32 %v437_v61, %v347_v60 }
 0x2d4   :  { %v332_v2 = vsel %vm331_vm3, %v329_v63, %v326_v62 }
 0x2d5   :  { %v333_v4 = vadd.f32 %v332_v2, %v323_v0  ;;  %v352_v6 = vsub.f32 0.0, %v350_v1 }
 0x2d7   :  { %v338_v7 = vsub.f32 %v337_v5, %v333_v4  ;;  %v353_v8 = vsel %vm351_vm5, %v350_v1, %v352_v6 }
 0x2d8   :  { %354 = vst.msk [vmem:[#allocation11] sm:$0xff] %vm341_vm4, %v353_v8 }
 0x2d9   :  { %v339_v10 = vmul.f32 2.0, %v338_v7 }
 0x2db   :  { %v340_v11 = vsub.f32 %v388_v9, %v339_v10 }
 0x2dd   :  { %v342_v12 = vsel %vm341_vm4, %v340_v11, 0.0 }
 0x2de   :  { %343 = vadd.xlane.f32.xlu0 %v342_v12 }
 0x2df   :  { %549 = shalt.err (!%p546_p1)
}
 0x2e0   :  { %364 = dma.vmem_to_hbm [thread:$0]  %s362_s7, 128, %s669_s8, [#allocation4]   ;;  %vm345_vm6 = vcmask 7168  }
 0x367   :  { %v344_v13 = vpop.xlane.xlu0 %343 }
 0x368   :  { %346 = vst.msk [vmem:[%s670_s9] sm:$0xff] %vm345_vm6, %v344_v13 }
 0x369   :  { %564 = dma.done.wait [#allocation4], 128  }
 0x36a   :  { %565 = vsyncadd [#allocation4], 4294967168 }
 0x36b   :  { %372 = vsyncpa [#allocation3], 1 }
 0x36c   :  { %373 = vsyncpa [#allocation6], 1 }
 0x36d   :  { %374 = vsyncpa [#allocation9], 1 }
 0x36e   :  { %375 = vsyncpa [#allocation4], 1 }

// kernel: tpu_custom_call.1
= control target key start
LH: loop header
LB: loop body
LE: loop exit
PB: predicated region body
PF: predicated region fallthrough
CT: control target
= control target key end

     0   :  { %15 = vsyncpa [#allocation3], 0  ;;  %s661_s0 = inlined_call_operand.hbm [shape: f32[8,16], index: 0, kind: input, shape index: {}]   ;;  %s662_s1 = inlined_call_operand.hbm [shape: f32[8,8], index: 1, kind: input, shape index: {}]   ;;  %s663_s2 = inlined_call_operand.hbm [shape: bf16[16,32], index: 2, kind: input, shape index: {}]   ;;  %s664_s3 = inlined_call_operand.vmem [shape: f32[1,32], index: 3, kind: input, shape index: {}]   ;;  %s665_s4 = inlined_call_operand.hbm [shape: bf16[32,32], index: 4, kind: input, shape index: {}]   ;;  %s666_s5 = inlined_call_operand.vmem [shape: f32[1,32], index: 5, kind: input, shape index: {}]   ;;  %s667_s6 = inlined_call_operand.hbm [shape: bf16[32,256], index: 6, kind: input, shape index: {}]   ;;  %s668_s7 = inlined_call_operand.vmem [shape: f32[1,256], index: 7, kind: input, shape index: {}]   ;;  %s669_s8 = inlined_call_operand.hbm [shape: f32[8,8], index: 8, kind: output, shape index: {0}]   ;;  %s670_s9 = inlined_call_operand.vmem [shape: f32[8,1], index: 9, kind: output, shape index: {1}]  }
   0x1   :  { %16 = vsyncpa [#allocation6], 0 }
   0x2   :  { %17 = vsyncpa [#allocation9], 0 }
   0x3   :  { %18 = vsyncpa [#allocation4], 0  ;;  %s566_s30 = smov [#allocation5]  }
   0x4   :  { %s35_s10 = sshll.u32 %s566_s30, 4  ;;  %s36_s10 = int_to_ptr.vmem [resolvable:$true] %s35_s10 }
   0x5   :  { %s446_s11 = scalar_lea.vmem %s36_s10, 128  ;;  %p451_p1 = scmp.lt.s32.totalorder %s36_s10, %s36_s10 }
   0x6   :  { %p447_p0 = scmp.ne.s32.totalorder %s36_s10, %s446_s11  ;;  %p452_p2 = scmp.lt.s32.totalorder %s446_s11, %s446_s11 }
   0x8   :  { %p453_p3 = por %p452_p2, %p451_p1 }
   0xa   :  { %p454_p4 = pnand %p453_p3, %p447_p0 }
   0xc   :  { %457 = shalt.err (!%p454_p4)
}
   0xd   :  { %38 = dma.hbm_to_vmem [thread:$0]  %s662_s1, 128, %s36_s10, [#allocation6]  }
   0xe   :  { %s567_s14 = smov [#allocation8]   ;;  %s568_s16 = smov [#allocation2]  }
   0xf   :  { %s58_s15 = sshll.u32 %s567_s14, 4  ;;  %s25_s17 = sshll.u32 %s568_s16, 4  ;;  %s59_s15 = int_to_ptr.vmem [resolvable:$true] %s58_s15  ;;  %s26_s17 = int_to_ptr.vmem [resolvable:$true] %s25_s17 }
  0x10   :  { %s466_s18 = scalar_lea.vmem %s59_s15, 256  ;;  %p471_p6 = scmp.lt.s32.totalorder %s59_s15, %s59_s15 }
  0x11   :  { %p467_p5 = scmp.ne.s32.totalorder %s59_s15, %s466_s18  ;;  %p472_p7 = scmp.lt.s32.totalorder %s466_s18, %s466_s18 }
  0x13   :  { %p473_p8 = por %p472_p7, %p471_p6 }
  0x15   :  { %p474_p9 = pnand %p473_p8, %p467_p5 }
  0x17   :  { %477 = shalt.err (!%p474_p9)
}
  0x18   :  { %s569_s19 = smov 64   ;;  %s570_s20 = smov 4  }
  0x19   :  { %64 = dma.hbm_to_vmem [thread:$0]  %s665_s4, 256, %s59_s15, [#allocation9], %s569_s19, %s569_s19, %s570_s20  }
  0x1a   :  { %s486_s1 = scalar_lea.vmem %s26_s17, 128  ;;  %p491_p11 = scmp.lt.s32.totalorder %s26_s17, %s26_s17 }
  0x1b   :  { %p487_p10 = scmp.ne.s32.totalorder %s26_s17, %s486_s1  ;;  %p492_p12 = scmp.lt.s32.totalorder %s486_s1, %s486_s1 }
  0x1d   :  { %p493_p13 = por %p492_p12, %p491_p11 }
  0x1f   :  { %p494_p0 = pnand %p493_p13, %p487_p10 }
  0x21   :  { %497 = shalt.err (!%p494_p0)
}
  0x22   :  { %28 = dma.hbm_to_vmem [thread:$0]  %s661_s0, 128, %s26_s17, [#allocation3]  }
  0x23   :  { %s571_s25 = smov [#allocation7]   ;;  %s572_s27 = smov [#allocation10]  }
  0x24   :  { %s44_s26 = sshll.u32 %s571_s25, 4  ;;  %s72_s28 = sshll.u32 %s572_s27, 4  ;;  %s45_s26 = int_to_ptr.vmem [resolvable:$true] %s44_s26  ;;  %s73_s28 = int_to_ptr.vmem [resolvable:$true] %s72_s28 }
  0x25   :  { %s506_s29 = scalar_lea.vmem %s45_s26, 128  ;;  %p511_p2 = scmp.lt.s32.totalorder %s45_s26, %s45_s26 }
  0x26   :  { %p507_p1 = scmp.ne.s32.totalorder %s45_s26, %s506_s29  ;;  %p512_p3 = scmp.lt.s32.totalorder %s506_s29, %s506_s29 }
  0x28   :  { %p513_p4 = por %p512_p3, %p511_p2 }
  0x2a   :  { %p514_p5 = pnand %p513_p4, %p507_p1 }
  0x2c   :  { %517 = shalt.err (!%p514_p5)
}
  0x2d   :  { %50 = dma.hbm_to_vmem [thread:$0]  %s663_s2, 128, %s45_s26, [#allocation6], %s569_s19, %s569_s19, %s570_s20  }
  0x2e   :  { %s526_s10 = scalar_lea.vmem %s73_s28, 512  ;;  %p531_p7 = scmp.lt.s32.totalorder %s73_s28, %s73_s28 }
  0x2f   :  { %p527_p6 = scmp.ne.s32.totalorder %s73_s28, %s526_s10  ;;  %p532_p8 = scmp.lt.s32.totalorder %s526_s10, %s526_s10 }
  0x31   :  { %p533_p9 = por %p532_p8, %p531_p7 }
  0x33   :  { %p534_p10 = pnand %p533_p9, %p527_p6 }
  0x35   :  { %537 = shalt.err (!%p534_p10)
}
  0x36   :  { %s573_s0 = smov 128   ;;  %s574_s11 = smov 8  }
  0x37   :  { %78 = dma.hbm_to_vmem [thread:$0]  %s667_s6, 512, %s73_s28, [#allocation9], %s573_s0, %s573_s0, %s574_s11  }
  0x38   :  { %558 = dma.done.wait [#allocation3], 128  }
  0x39   :  { %559 = vsyncadd [#allocation3], 4294967168 }
  0x3a   :  { %560 = dma.done.wait [#allocation6], 256  }
  0x3b   :  { %561 = vsyncadd [#allocation6], 4294967040 }
  0x3c   :  { %562 = dma.done.wait [#allocation9], 768  }
  0x3d   :  { %563 = vsyncadd [#allocation9], 4294966528  ;;  %v575_v0 = vmov 0.0   ;;  %vm576_vm0 = vmmov 0   ;;  %v421_v1 = vld [vmem:[#allocation7] sm:$0xff]   ;;  %v98_v2 = vld [vmem:[#allocation2] sm:$0xff]  ;;  %v236_v27 = vlaneseq }
  0x3e   :  { %394 = vmatprep.subr.bf16.mxu0 %v575_v0  ;;  %396 = vmatprep.mubr.msk.bf16.mxu0 %vm576_vm0, %v575_v0  ;;  %vm115_vm1 = vcmask 130048   ;;  %v99_v3 = vpack.c.bf16 %v98_v2, %v98_v2  ;;  %v422_v4 = vld [vmem:[#allocation8 + $0x8] sm:$0xff]   ;;  %v423_v5 = vld [vmem:[#allocation8] sm:$0xff]   ;;  %vm184_vm2 = vcmask 261120   ;;  %v429_v16 = vld [vmem:[#allocation10 + $0x4] ss:$8 sps:$4 sm:$0xff]  }
  0x3f   :  { %400 = vmatprep.subr.bf16.mxu1 %v575_v0  ;;  %404 = vmatprep.mubr.msk.bf16.mxu1 %vm576_vm0, %v575_v0  ;;  %v424_v6 = vld [vmem:[#allocation10 + $0x10] ss:$8 sps:$4 sm:$0xff]   ;;  %v426_v7 = vld [vmem:[#allocation10 + $0x14] ss:$8 sps:$4 sm:$0xff]   ;;  %v427_v17 = vld [vmem:[#allocation10] ss:$8 sps:$4 sm:$0xff]  }
  0x40   :  { %395 = vmatpush3.bf16.msra.mxu0 %v421_v1  ;;  %401 = vmatpush3.bf16.msra.mxu1 %v422_v4  ;;  %v376_v8 = vld [vmem:[%s664_s3] ss:$0 sm:$0xff]  ;;  %v577_v18 = vmov 0   ;;  %v237_v28 = vshrl.u32 %v236_v27, 7  ;;  %v97_v43 = vld [vmem:[#allocation5] sm:$0xff]  ;;  %vm341_vm4 = vcmask 64512  }
  0x41   :  { %402 = vmatprep.subr.bf16.mxu1 %v575_v0  ;;  %281 = vmatprep.subr.bf16.mxu0 %v426_v7  ;;  %v379_v19 = vld [vmem:[%s666_s5] ss:$0 sm:$0xff]  ;;  %v316_v52 = vmul.f32 0.5, %v97_v43  ;;  %s578_s5 = smov [#allocation11]  }
  0x42   :  { %v242_v29 = vsub.s32 1, %v237_v28  ;;  %v234_v30 = vld [vmem:[%s668_s7] sm:$0x3]  ;;  %v238_v40 = vsub.s32 0, %v237_v28  ;;  %s361_s7 = sshll.u32 %s578_s5, 4  ;;  %s362_s7 = int_to_ptr.vmem [resolvable:$true] %s361_s7 }
  0x43   :  { %397 = vmatmul.mubr.msk.bf16.vlgmr.msra.gmra.mxu0 %vm115_vm1, %v99_v3  ;;  %v317_v54 = vmul.f32 %v316_v52, %v97_v43  ;;  %s538_s17 = scalar_lea.vmem %s362_s7, 128  ;;  %p543_p12 = scmp.lt.s32.totalorder %s362_s7, %s362_s7 }
  0x44   :  { %403 = vmatpush3.bf16.msra.mxu1 %v423_v5  ;;  %282 = vmatpush1.bf16.msra.mxu0 %v424_v6  ;;  %v243_v31 = vrot.slane %v234_v30, %v242_v29  ;;  %v239_v41 = vrot.slane %v234_v30, %v238_v40  ;;  %p539_p11 = scmp.ne.s32.totalorder %s362_s7, %s538_s17  ;;  %p544_p13 = scmp.lt.s32.totalorder %s538_s17, %s538_s17 }
  0x45   :  { %283 = vmatprep.subr.bf16.mxu0 %v429_v16  ;;  %301 = vmatprep.mubr.bf16.mxu0 %v577_v18  ;;  %v334_v59 = vsub.f32 0.0, %v317_v54 }
  0x46   :  { %p545_p0 = por %p544_p13, %p543_p12 }
  0x48   :  { %284 = vmatpush1.bf16.msra.mxu0 %v427_v17  ;;  %p546_p1 = pnand %p545_p0, %p539_p11 }
 0x103   :  { %v153_v9 = vpop.f32.mrf.mxu0 }
 0x104   :  { %v154_v10 = vadd.f32 %v376_v8, %v153_v9 }
 0x105   :  { %v398_v11 = vpop.f32.mrf.mxu0 }
 0x106   :  { %v159_v12 = vmax.f32 %v154_v10, 0.0 }
 0x107   :  { %v156_v13 = vpop.f32.mrf.mxu0 }
 0x108   :  { %v160_v14 = vpack.c.bf16 %v159_v12, %v159_v12 }
 0x109   :  { %v399_v15 = vpop.f32.mrf.mxu0 }
 0x10a   :  { %405 = vmatmul.mubr.msk.bf16.vlgmr.msra.gmra.mxu1 %vm184_vm2, %v160_v14 }
 0x1ca   :  { %v222_v20 = vpop.f32.mrf.mxu1 }
 0x1cb   :  { %v223_v21 = vadd.f32 %v379_v19, %v222_v20 }
 0x1cc   :  { %v406_v22 = vpop.f32.mrf.mxu1 }
 0x1cd   :  { %v228_v23 = vmax.f32 %v223_v21, 0.0 }
 0x1ce   :  { %v225_v24 = vpop.f32.mrf.mxu1 }
 0x1cf   :  { %v229_v25 = vpack.c.bf16 %v228_v23, %v228_v23 }
 0x1d0   :  { %v407_v26 = vpop.f32.mrf.mxu1 }
 0x1d1   :  { %387 = vmatmul.mubr.msk.bf16.vlgmr.msra.gmra.mxu0 %vm184_vm2, %v229_v25 }
 0x291   :  { %v303_v32 = vpop.f32.mrf.mxu0 }
 0x292   :  { %v304_v44 = vadd.f32 %v303_v32, %v239_v41 }
 0x293   :  { %v305_v33 = vpop.f32.mrf.mxu0 }
 0x294   :  { %v306_v34 = vadd.f32 %v305_v33, %v243_v31 }
 0x295   :  { %v307_v35 = vpop.f32.mrf.mxu0 }
 0x296   :  { %v310_v36 = vmax.f32 %v306_v34, -20.0 }
 0x297   :  { %v308_v37 = vpop.f32.mrf.mxu0 }
 0x298   :  { %v311_v38 = vmin.f32 %v310_v36, 2.0 }
 0x29a   :  { %v312_v39 = vmul.f32 1.442695, %v311_v38  ;;  %v335_v3 = vsub.f32 %v334_v59, %v311_v38 }
 0x29c   :  { %430 = vpow2.f32 %v312_v39  ;;  %v388_v9 = vadd.f32 -0.9189385, %v335_v3 }
 0x2a9   :  { %v431_v42 = vpop.eup %430 }
 0x2aa   :  { %v314_v45 = vmul.f32 %v431_v42, %v97_v43 }
 0x2ac   :  { %v315_v46 = vadd.f32 %v314_v45, %v304_v44 }
 0x2ae   :  { %v318_v47 = vand.u32 2147483647, %v315_v46  ;;  %v322_v56 = vmul.f32 -2.0, %v315_v46  ;;  %v337_v5 = vsub.f32 0.6931472, %v315_v46  ;;  %vm351_vm5 = vcmp.ge.f32.partialorder %v315_v46, 0.0 }
 0x2b0   :  { %v319_v48 = vmul.f32 -2.0, %v318_v47  ;;  %v323_v0 = vmax.f32 %v322_v56, 0.0 }
 0x2b2   :  { %v320_v49 = vmul.f32 1.442695, %v319_v48 }
 0x2b4   :  { %432 = vpow2.f32 %v320_v49 }
 0x2c1   :  { %v433_v50 = vpop.eup %432 }
 0x2c2   :  { %v324_v51 = vadd.f32 1.0, %v433_v50  ;;  %v327_v53 = vmul.f32 -0.5, %v433_v50  ;;  %v330_v57 = vand.u32 2147483647, %v433_v50  ;;  %v347_v60 = vsub.f32 1.0, %v433_v50 }
 0x2c4   :  { %434 = vlog2.f32 %v324_v51  ;;  %v328_v55 = vadd.f32 1.0, %v327_v53  ;;  %vm331_vm3 = vcmp.lt.f32.partialorder %v330_v57, 0.0004427343 }
 0x2c5   :  { %436 = vrcp.f32 %v324_v51 }
 0x2c6   :  { %v329_v63 = vmul.f32 %v433_v50, %v328_v55 }
 0x2d1   :  { %v435_v58 = vpop.eup %434 }
 0x2d2   :  { %v437_v61 = vpop.eup %436  ;;  %v326_v62 = vmul.f32 0.6931472, %v435_v58 }
 0x2d3   :  { %v350_v1 = vmul.f32 %v437_v61, %v347_v60 }
 0x2d4   :  { %v332_v2 = vsel %vm331_vm3, %v329_v63, %v326_v62 }
 0x2d5   :  { %v333_v4 = vadd.f32 %v332_v2, %v323_v0  ;;  %v352_v6 = vsub.f32 0.0, %v350_v1 }
 0x2d7   :  { %v338_v7 = vsub.f32 %v337_v5, %v333_v4  ;;  %v353_v8 = vsel %vm351_vm5, %v350_v1, %v352_v6 }
 0x2d8   :  { %354 = vst.msk [vmem:[#allocation11] sm:$0xff] %vm341_vm4, %v353_v8 }
 0x2d9   :  { %v339_v10 = vmul.f32 2.0, %v338_v7 }
 0x2db   :  { %v340_v11 = vsub.f32 %v388_v9, %v339_v10 }
 0x2dd   :  { %v342_v12 = vsel %vm341_vm4, %v340_v11, 0.0 }
 0x2de   :  { %343 = vadd.xlane.f32.xlu0 %v342_v12 }
 0x2df   :  { %549 = shalt.err (!%p546_p1)
}
 0x2e0   :  { %364 = dma.vmem_to_hbm [thread:$0]  %s362_s7, 128, %s669_s8, [#allocation4]   ;;  %vm345_vm6 = vcmask 7168  }
 0x367   :  { %v344_v13 = vpop.xlane.xlu0 %343 }
 0x368   :  { %346 = vst.msk [vmem:[%s670_s9] sm:$0xff] %vm345_vm6, %v344_v13 }
 0x369   :  { %564 = dma.done.wait [#allocation4], 128  }
 0x36a   :  { %565 = vsyncadd [#allocation4], 4294967168 }
 0x36b   :  { %372 = vsyncpa [#allocation3], 1 }
 0x36c   :  { %373 = vsyncpa [#allocation6], 1 }
 0x36d   :  { %374 = vsyncpa [#allocation9], 1 }
 0x36e   :  { %375 = vsyncpa [#allocation4], 1 }

</bundles_post_ra>
